<compile_context>
chip_gen: v7x
topology: tpu7x:2x2x1
jax: 0.10.0
libtpu: 0.0.40
codegen_flags: <defaults>
</compile_context>

<pallas_src>
import functools

import numpy as np
import jax
import jax.numpy as jnp
from jax.experimental import pallas as pl
from jax.experimental.pallas import tpu as pltpu

LANES = 128
MAX_BLOCK_ROWS = 4096            # 4096 x 128 f32 = 2 MiB per block


@functools.lru_cache(maxsize=1)
def _vmem_limit_bytes():
    """Generation-aware scoped-VMEM limit (v5e/v6e: up to 96 MiB, v7x: 48 MiB)."""
    cap = 64 * 1024 * 1024
    try:
        info = pltpu.get_tpu_info()
        cap = int(getattr(info, "vmem_capacity_bytes", cap))
    except Exception:
        pass
    return int(min(cap * 3 // 4, 96 * 1024 * 1024))


# ---------------------------------------------------------------------------
# Kernel A: per-pixel mask multiplicity  w[s] = sum_j [mask[j, s] == 1].
# grid = (tile [parallel], j over mask batch [arbitrary, accumulated])
# ---------------------------------------------------------------------------
def _mask_weight_kernel(mask_ref, w_ref):
    b = pl.program_id(1)

    @pl.when(b == 0)
    def _init():
        w_ref[...] = jnp.zeros_like(w_ref)

    m = mask_ref[0]                                   # (BR, 128)
    w_ref[...] += (m >= 1.0).astype(jnp.float32)


def _mask_weights(mask3, block_rows, vmem_limit):
    n, s_rows, c = mask3.shape
    n_tiles = s_rows // block_rows
    return pl.pallas_call(
        _mask_weight_kernel,
        out_shape=jax.ShapeDtypeStruct((s_rows, c), jnp.float32),
        grid_spec=pltpu.PrefetchScalarGridSpec(
            num_scalar_prefetch=0,
            grid=(n_tiles, n),
            in_specs=[pl.BlockSpec((1, block_rows, c), lambda t, b: (b, t, 0))],
            out_specs=pl.BlockSpec((block_rows, c), lambda t, b: (t, 0)),
        ),
        compiler_params=pltpu.CompilerParams(
            dimension_semantics=("parallel", "arbitrary"),
            vmem_limit_bytes=vmem_limit),
    )(mask3)


# ---------------------------------------------------------------------------
# Kernel B: BCE loss + weighted reductions + per-(i,s) negative-loss candidates.
# grid = (tile [parallel], i over pred/gt batch [arbitrary, accumulated]).
# The weight slab w[s] is resident across the inner batch loop.
# ---------------------------------------------------------------------------
def _bce_stats_kernel(pred_ref, gt_ref, w_ref,
                      negval_ref, psum_ref, pcnt_ref, ncnt_ref):
    b = pl.program_id(1)

    @pl.when(b == 0)
    def _init():
        psum_ref[...] = jnp.zeros_like(psum_ref)
        pcnt_ref[...] = jnp.zeros_like(pcnt_ref)
        ncnt_ref[...] = jnp.zeros_like(ncnt_ref)

    p = pred_ref[0]                                   # (BR, 128)
    g = gt_ref[0]
    wv = w_ref[...]                                   # (BR, 128), resident

    log_p = jnp.maximum(jnp.log(p), -100.0)           # PyTorch BCE log clamp
    log_1mp = jnp.maximum(jnp.log(1.0 - p), -100.0)
    loss = -(g * log_p + (1.0 - g) * log_1mp)

    # byte((gt)*(mask)) / byte((1-gt)*(mask)) for gt, mask in [0,1] factorize as
    # [gt==1]*[mask==1] and [gt==0]*[mask==1].
    posind = (g >= 1.0).astype(jnp.float32)
    negind = (g <= 0.0).astype(jnp.float32)

    # Candidate negative-loss value per (i, s); its multiplicity w[s] is applied
    # in the weighted top-k walk outside.
    negval_ref[...] = (loss * negind)[None]

    br, c = g.shape

    def fold(x):  # (BR,128) -> (8,128): pure vreg-wise VPU adds, no XLU per step
        return jnp.sum(x.reshape(br // 8, 8, c), axis=0)

    psum_ref[...] += fold(loss * posind * wv)[None]
    pcnt_ref[...] += fold(posind * wv)[None]
    ncnt_ref[...] += fold(negind * wv)[None]


def _bce_stats(pred3, gt3, w2, block_rows, vmem_limit):
    n, s_rows, c = pred3.shape
    n_tiles = s_rows // block_rows

    io_spec = pl.BlockSpec((1, block_rows, c), lambda t, b: (b, t, 0))
    w_spec = pl.BlockSpec((block_rows, c), lambda t, b: (t, 0))
    acc_spec = pl.BlockSpec((1, 8, c), lambda t, b: (t, 0, 0))

    return pl.pallas_call(
        _bce_stats_kernel,
        out_shape=(
            jax.ShapeDtypeStruct((n, s_rows, c), jnp.float32),   # negval[i, s]
            jax.ShapeDtypeStruct((n_tiles, 8, c), jnp.float32),  # pos-loss partials
            jax.ShapeDtypeStruct((n_tiles, 8, c), jnp.float32),  # pos-count partials
            jax.ShapeDtypeStruct((n_tiles, 8, c), jnp.float32),  # neg-count partials
        ),
        grid_spec=pltpu.PrefetchScalarGridSpec(
            num_scalar_prefetch=0,
            grid=(n_tiles, n),
            in_specs=[io_spec, io_spec, w_spec],
            out_specs=(io_spec, acc_spec, acc_spec, acc_spec),
        ),
        compiler_params=pltpu.CompilerParams(
            dimension_semantics=("parallel", "arbitrary"),
            vmem_limit_bytes=vmem_limit),
    )(pred3, gt3, w2)


# ---------------------------------------------------------------------------
# Wrapper reproducing BalanceCrossEntropyLoss.forward (return_origin=False)
# ---------------------------------------------------------------------------
def balance_cross_entropy_loss(pred, gt, mask, negative_ratio=3.0, eps=1e-6):
    pred = pred.astype(jnp.float32)
    gt = gt.astype(jnp.float32)
    mask = mask.astype(jnp.float32)

    n = pred.shape[0]
    s = int(np.prod(pred.shape[1:]))     # 1*H*W
    assert int(np.prod(gt.shape[1:])) == s and int(np.prod(mask.shape[1:])) == s

    rows_needed = (s + LANES - 1) // LANES
    block_rows = min(MAX_BLOCK_ROWS, ((rows_needed + 7) // 8) * 8)
    s_rows = ((rows_needed + block_rows - 1) // block_rows) * block_rows
    s_pad = s_rows * LANES

    def prep(x, pad_val):
        x = jnp.reshape(x, (n, s))
        x = jnp.pad(x, ((0, 0), (0, s_pad - s)), constant_values=pad_val)
        return x.reshape(n, s_rows, LANES)

    pred3 = prep(pred, 0.5)    # finite BCE in pad region
    gt3 = prep(gt, 0.0)
    mask3 = prep(mask, 0.0)    # w == 0 in pad region -> padded values carry zero weight

    vmem_limit = _vmem_limit_bytes()

    # Pass 1: per-pixel mask multiplicity  (reads N*S, writes S).
    w2 = _mask_weights(mask3, block_rows, vmem_limit)

    # Pass 2: BCE + weighted reductions + negative candidates (reads 3*N*S-ish,
    # writes N*S).  The (N,N,H,W) broadcast is never formed.
    negval, psum_p, pcnt_p, ncnt_p = _bce_stats(pred3, gt3, w2, block_rows, vmem_limit)

    pos_sum = jnp.sum(psum_p)
    pos_count = jnp.sum(jnp.round(pcnt_p).astype(jnp.int32))
    neg_total = jnp.sum(jnp.round(ncnt_p).astype(jnp.int32))
    neg_count = jnp.minimum(
        neg_total,
        jnp.floor(pos_count.astype(jnp.float32) * negative_ratio).astype(jnp.int32))

    # Weighted top-k sum over N*S (value, multiplicity) candidates.
    # TODO(synk): the dynamic-k select (an O(n log n) sort over N*S candidates)
    # stays in XLA; there is no clean Pallas TPU sort/top-k primitive.
    flat_v = negval.reshape(-1)                                   # (N*S_pad,)
    w_i32 = jnp.round(w2).astype(jnp.int32)
    flat_w = jnp.broadcast_to(w_i32.reshape(1, -1), (n, s_pad)).reshape(-1)

    neg_key, w_sorted = jax.lax.sort((-flat_v, flat_w), num_keys=1,
                                     is_stable=False)
    v_desc = -neg_key                              # values, descending
    cumw = jnp.cumsum(w_sorted)                    # int32: exact weight walk
    prev = cumw - w_sorted                         # weight strictly above this value slot
    take = jnp.clip(neg_count - prev, 0, w_sorted).astype(jnp.float32)
    topk_sum = jnp.sum(v_desc * take)

    denom = (pos_count + neg_count).astype(jnp.float32) + eps
    return (pos_sum + topk_sum) / denom


# ---------------------------------------------------------------------------
# Pure-numpy reference mimicking the PyTorch module (full broadcast + sort)
# ---------------------------------------------------------------------------
def _reference(pred, gt, mask, negative_ratio=3.0, eps=1e-6):
    pred = np.asarray(pred, np.float32)
    gt = np.asarray(gt, np.float32)
    mask = np.asarray(mask, np.float32)
    positive = (gt * mask).astype(np.uint8).astype(np.float32)
    negative = ((1.0 - gt) * mask).astype(np.uint8).astype(np.float32)
    positive_count = int(positive.sum())
    negative_count = min(int(negative.sum()), int(positive_count * negative_ratio))
    loss = -(gt * np.clip(np.log(pred), -100.0, None)
             + (1.0 - gt) * np.clip(np.log(1.0 - pred), -100.0, None))
    positive_loss = loss * positive
    negative_loss = (loss * negative).reshape(-1)
    topk = np.sort(negative_loss)[::-1][:negative_count]
    return (positive_loss.sum() + topk.sum()) / (positive_count + negative_count + eps)


if __name__ == "__main__":
    key = jax.random.PRNGKey(0)
    k1, k2, k3 = jax.random.split(key, 3)
    N, H, W = 2, 16, 16
    pred = jax.nn.sigmoid(jax.random.normal(k1, (N, 1, H, W), jnp.float32))
    gt = (jax.random.uniform(k2, (N, 1, H, W)) > 0.5).astype(jnp.float32)
    mask = (jax.random.uniform(k3, (N, H, W)) > 0.3).astype(jnp.float32)

    out = jax.jit(balance_cross_entropy_loss)(pred, gt, mask)
    out = jax.block_until_ready(out)

    ref = _reference(np.asarray(pred), np.asarray(gt), np.asarray(mask))
    assert np.allclose(float(out), float(ref), rtol=1e-4, atol=1e-5), (float(out), float(ref))
    print("KERNEL_OK")
</pallas_src>

<mosaic_0001>
module attributes {stable_mosaic.version = 11 : i64} {
  func.func @_mask_weight_kernel(%arg0: i32, %arg1: i32, %arg2: memref<1x8x128xf32, #tpu.memory_space<vmem>>, %arg3: memref<8x128xf32, #tpu.memory_space<vmem>>) attributes {dimension_semantics = [#tpu.dimension_semantics<parallel>, #tpu.dimension_semantics<arbitrary>], iteration_bounds = array<i64: 1, 2>, scalar_prefetch = 0 : i64, scratch_operands = 0 : i64, tpu.core_type = #tpu.core_type<tc>, window_params = [{transform_indices = @transform_0, window_bounds = array<i64: 1, 8, 128>}, {transform_indices = @transform_1, window_bounds = array<i64: 8, 128>}]} {
    %c0_i32 = arith.constant 0 : i32
    %0 = arith.cmpi eq, %arg1, %c0_i32 : i32
    %1 = arith.extui %0 : i1 to i32
    %c0_i32_0 = arith.constant 0 : i32
    %2 = arith.cmpi ne, %1, %c0_i32_0 : i32
    scf.if %2 {
      %cst_7 = arith.constant 0.000000e+00 : f32
      %12 = vector.broadcast %cst_7 : f32 to vector<8x128xf32>
      %c0_8 = arith.constant 0 : index
      %c0_9 = arith.constant 0 : index
      %13 = vector.load %arg3[%c0_8, %c0_9] : memref<8x128xf32, #tpu.memory_space<vmem>>, vector<8x128xf32>
      tpu.vector_store %arg3[%c0_8, %c0_9], %12 {strides = array<i32>} : memref<8x128xf32, #tpu.memory_space<vmem>>, vector<8x128xf32>,
    } else {
    }
    %c0 = arith.constant 0 : index
    %c0_1 = arith.constant 0 : index
    %c0_2 = arith.constant 0 : index
    %3 = vector.load %arg2[%c0, %c0_1, %c0_2] : memref<1x8x128xf32, #tpu.memory_space<vmem>>, vector<1x8x128xf32>
    %4 = vector.shape_cast %3 : vector<1x8x128xf32> to vector<8x128xf32>
    %c0_3 = arith.constant 0 : index
    %c0_4 = arith.constant 0 : index
    %5 = vector.load %arg3[%c0_3, %c0_4] : memref<8x128xf32, #tpu.memory_space<vmem>>, vector<8x128xf32>
    %cst = arith.constant 1.000000e+00 : f32
    %6 = vector.broadcast %cst : f32 to vector<8x128xf32>
    %7 = arith.cmpf oge, %4, %6 : vector<8x128xf32>
    %8 = arith.extui %7 : vector<8x128xi1> to vector<8x128xi32>
    %9 = arith.sitofp %8 : vector<8x128xi32> to vector<8x128xf32>
    %10 = arith.addf %5, %9 : vector<8x128xf32>
    %c0_5 = arith.constant 0 : index
    %c0_6 = arith.constant 0 : index
    %11 = vector.load %arg3[%c0_5, %c0_6] : memref<8x128xf32, #tpu.memory_space<vmem>>, vector<8x128xf32>
    tpu.vector_store %arg3[%c0_5, %c0_6], %10 {strides = array<i32>} : memref<8x128xf32, #tpu.memory_space<vmem>>, vector<8x128xf32>,
    return
  }
  func.func @transform_0(%arg0: i32, %arg1: i32) -> (i32, i32, i32) {
    %c0_i32 = arith.constant 0 : i32
    %c0_i32_0 = arith.constant 0 : i32
    return %arg1, %arg0, %c0_i32 : i32, i32, i32
  }
  func.func @transform_1(%arg0: i32, %arg1: i32) -> (i32, i32) {
    %c0_i32 = arith.constant 0 : i32
    %c0_i32_0 = arith.constant 0 : i32
    return %arg0, %c0_i32 : i32, i32
  }
}

module attributes {stable_mosaic.version = 11 : i64} {
  func.func @_bce_stats_kernel(%arg0: i32, %arg1: i32, %arg2: memref<1x8x128xf32, #tpu.memory_space<vmem>>, %arg3: memref<1x8x128xf32, #tpu.memory_space<vmem>>, %arg4: memref<8x128xf32, #tpu.memory_space<vmem>>, %arg5: memref<1x8x128xf32, #tpu.memory_space<vmem>>, %arg6: memref<1x8x128xf32, #tpu.memory_space<vmem>>, %arg7: memref<1x8x128xf32, #tpu.memory_space<vmem>>, %arg8: memref<1x8x128xf32, #tpu.memory_space<vmem>>) attributes {dimension_semantics = [#tpu.dimension_semantics<parallel>, #tpu.dimension_semantics<arbitrary>], iteration_bounds = array<i64: 1, 2>, scalar_prefetch = 0 : i64, scratch_operands = 0 : i64, tpu.core_type = #tpu.core_type<tc>, window_params = [{transform_indices = @transform_0, window_bounds = array<i64: 1, 8, 128>}, {transform_indices = @transform_1, window_bounds = array<i64: 1, 8, 128>}, {transform_indices = @transform_2, window_bounds = array<i64: 8, 128>}, {transform_indices = @transform_3, window_bounds = array<i64: 1, 8, 128>}, {transform_indices = @transform_4, window_bounds = array<i64: 1, 8, 128>}, {transform_indices = @transform_5, window_bounds = array<i64: 1, 8, 128>}, {transform_indices = @transform_6, window_bounds = array<i64: 1, 8, 128>}]} {
    %c0_i32 = arith.constant 0 : i32
    %0 = arith.cmpi eq, %arg1, %c0_i32 : i32
    %1 = arith.extui %0 : i1 to i32
    %c0_i32_0 = arith.constant 0 : i32
    %2 = arith.cmpi ne, %1, %c0_i32_0 : i32
    scf.if %2 {
      %cst_38 = arith.constant 0.000000e+00 : f32
      %56 = vector.broadcast %cst_38 : f32 to vector<1x8x128xf32>
      %c0_39 = arith.constant 0 : index
      %c0_40 = arith.constant 0 : index
      %c0_41 = arith.constant 0 : index
      %57 = vector.load %arg6[%c0_39, %c0_40, %c0_41] : memref<1x8x128xf32, #tpu.memory_space<vmem>>, vector<1x8x128xf32>
      tpu.vector_store %arg6[%c0_39, %c0_40, %c0_41], %56 {strides = array<i32>} : memref<1x8x128xf32, #tpu.memory_space<vmem>>, vector<1x8x128xf32>,
      %cst_42 = arith.constant 0.000000e+00 : f32
      %58 = vector.broadcast %cst_42 : f32 to vector<1x8x128xf32>
      %c0_43 = arith.constant 0 : index
      %c0_44 = arith.constant 0 : index
      %c0_45 = arith.constant 0 : index
      %59 = vector.load %arg7[%c0_43, %c0_44, %c0_45] : memref<1x8x128xf32, #tpu.memory_space<vmem>>, vector<1x8x128xf32>
      tpu.vector_store %arg7[%c0_43, %c0_44, %c0_45], %58 {strides = array<i32>} : memref<1x8x128xf32, #tpu.memory_space<vmem>>, vector<1x8x128xf32>,
      %cst_46 = arith.constant 0.000000e+00 : f32
      %60 = vector.broadcast %cst_46 : f32 to vector<1x8x128xf32>
      %c0_47 = arith.constant 0 : index
      %c0_48 = arith.constant 0 : index
      %c0_49 = arith.constant 0 : index
      %61 = vector.load %arg8[%c0_47, %c0_48, %c0_49] : memref<1x8x128xf32, #tpu.memory_space<vmem>>, vector<1x8x128xf32>
      tpu.vector_store %arg8[%c0_47, %c0_48, %c0_49], %60 {strides = array<i32>} : memref<1x8x128xf32, #tpu.memory_space<vmem>>, vector<1x8x128xf32>,
    } else {
    }
    %c0 = arith.constant 0 : index
    %c0_1 = arith.constant 0 : index
    %c0_2 = arith.constant 0 : index
    %3 = vector.load %arg2[%c0, %c0_1, %c0_2] : memref<1x8x128xf32, #tpu.memory_space<vmem>>, vector<1x8x128xf32>
    %4 = vector.shape_cast %3 : vector<1x8x128xf32> to vector<8x128xf32>
    %c0_3 = arith.constant 0 : index
    %c0_4 = arith.constant 0 : index
    %c0_5 = arith.constant 0 : index
    %5 = vector.load %arg3[%c0_3, %c0_4, %c0_5] : memref<1x8x128xf32, #tpu.memory_space<vmem>>, vector<1x8x128xf32>
    %6 = vector.shape_cast %5 : vector<1x8x128xf32> to vector<8x128xf32>
    %c0_6 = arith.constant 0 : index
    %c0_7 = arith.constant 0 : index
    %7 = vector.load %arg4[%c0_6, %c0_7] : memref<8x128xf32, #tpu.memory_space<vmem>>, vector<8x128xf32>
    %8 = math.log %4 : vector<8x128xf32>
    %cst = arith.constant -1.000000e+02 : f32
    %9 = vector.broadcast %cst : f32 to vector<8x128xf32>
    %10 = arith.maximumf %8, %9 : vector<8x128xf32>
    %cst_8 = arith.constant 1.000000e+00 : f32
    %11 = vector.broadcast %cst_8 : f32 to vector<8x128xf32>
    %12 = arith.subf %11, %4 : vector<8x128xf32>
    %13 = math.log %12 : vector<8x128xf32>
    %cst_9 = arith.constant -1.000000e+02 : f32
    %14 = vector.broadcast %cst_9 : f32 to vector<8x128xf32>
    %15 = arith.maximumf %13, %14 : vector<8x128xf32>
    %16 = arith.mulf %6, %10 : vector<8x128xf32>
    %cst_10 = arith.constant 1.000000e+00 : f32
    %17 = vector.broadcast %cst_10 : f32 to vector<8x128xf32>
    %18 = arith.subf %17, %6 : vector<8x128xf32>
    %19 = arith.mulf %18, %15 : vector<8x128xf32>
    %20 = arith.addf %16, %19 : vector<8x128xf32>
    %cst_11 = arith.constant 0.000000e+00 : f32
    %21 = vector.broadcast %cst_11 : f32 to vector<8x128xf32>
    %22 = arith.subf %21, %20 : vector<8x128xf32>
    %cst_12 = arith.constant 1.000000e+00 : f32
    %23 = vector.broadcast %cst_12 : f32 to vector<8x128xf32>
    %24 = arith.cmpf oge, %6, %23 : vector<8x128xf32>
    %25 = arith.extui %24 : vector<8x128xi1> to vector<8x128xi32>
    %26 = arith.sitofp %25 : vector<8x128xi32> to vector<8x128xf32>
    %cst_13 = arith.constant 0.000000e+00 : f32
    %27 = vector.broadcast %cst_13 : f32 to vector<8x128xf32>
    %28 = arith.cmpf ole, %6, %27 : vector<8x128xf32>
    %29 = arith.extui %28 : vector<8x128xi1> to vector<8x128xi32>
    %30 = arith.sitofp %29 : vector<8x128xi32> to vector<8x128xf32>
    %31 = arith.mulf %22, %30 : vector<8x128xf32>
    %32 = vector.shape_cast %31 : vector<8x128xf32> to vector<1x8x128xf32>
    %c0_14 = arith.constant 0 : index
    %c0_15 = arith.constant 0 : index
    %c0_16 = arith.constant 0 : index
    %33 = vector.load %arg5[%c0_14, %c0_15, %c0_16] : memref<1x8x128xf32, #tpu.memory_space<vmem>>, vector<1x8x128xf32>
    tpu.vector_store %arg5[%c0_14, %c0_15, %c0_16], %32 {strides = array<i32>} : memref<1x8x128xf32, #tpu.memory_space<vmem>>, vector<1x8x128xf32>,
    %c0_17 = arith.constant 0 : index
    %c0_18 = arith.constant 0 : index
    %c0_19 = arith.constant 0 : index
    %34 = vector.load %arg6[%c0_17, %c0_18, %c0_19] : memref<1x8x128xf32, #tpu.memory_space<vmem>>, vector<1x8x128xf32>
    %35 = arith.mulf %22, %26 : vector<8x128xf32>
    %36 = arith.mulf %35, %7 : vector<8x128xf32>
    %37 = vector.shape_cast %36 : vector<8x128xf32> to vector<1x8x128xf32>
    %cst_20 = arith.constant dense<0.000000e+00> : vector<8x128xf32>
    %38 = vector.multi_reduction <add>, %37, %cst_20 [0] : vector<1x8x128xf32> to vector<8x128xf32>
    %39 = vector.shape_cast %38 : vector<8x128xf32> to vector<1x8x128xf32>
    %40 = arith.addf %34, %39 : vector<1x8x128xf32>
    %c0_21 = arith.constant 0 : index
    %c0_22 = arith.constant 0 : index
    %c0_23 = arith.constant 0 : index
    %41 = vector.load %arg6[%c0_21, %c0_22, %c0_23] : memref<1x8x128xf32, #tpu.memory_space<vmem>>, vector<1x8x128xf32>
    tpu.vector_store %arg6[%c0_21, %c0_22, %c0_23], %40 {strides = array<i32>} : memref<1x8x128xf32, #tpu.memory_space<vmem>>, vector<1x8x128xf32>,
    %c0_24 = arith.constant 0 : index
    %c0_25 = arith.constant 0 : index
    %c0_26 = arith.constant 0 : index
    %42 = vector.load %arg7[%c0_24, %c0_25, %c0_26] : memref<1x8x128xf32, #tpu.memory_space<vmem>>, vector<1x8x128xf32>
    %43 = arith.mulf %26, %7 : vector<8x128xf32>
    %44 = vector.shape_cast %43 : vector<8x128xf32> to vector<1x8x128xf32>
    %cst_27 = arith.constant dense<0.000000e+00> : vector<8x128xf32>
    %45 = vector.multi_reduction <add>, %44, %cst_27 [0] : vector<1x8x128xf32> to vector<8x128xf32>
    %46 = vector.shape_cast %45 : vector<8x128xf32> to vector<1x8x128xf32>
    %47 = arith.addf %42, %46 : vector<1x8x128xf32>
    %c0_28 = arith.constant 0 : index
    %c0_29 = arith.constant 0 : index
    %c0_30 = arith.constant 0 : index
    %48 = vector.load %arg7[%c0_28, %c0_29, %c0_30] : memref<1x8x128xf32, #tpu.memory_space<vmem>>, vector<1x8x128xf32>
    tpu.vector_store %arg7[%c0_28, %c0_29, %c0_30], %47 {strides = array<i32>} : memref<1x8x128xf32, #tpu.memory_space<vmem>>, vector<1x8x128xf32>,
    %c0_31 = arith.constant 0 : index
    %c0_32 = arith.constant 0 : index
    %c0_33 = arith.constant 0 : index
    %49 = vector.load %arg8[%c0_31, %c0_32, %c0_33] : memref<1x8x128xf32, #tpu.memory_space<vmem>>, vector<1x8x128xf32>
    %50 = arith.mulf %30, %7 : vector<8x128xf32>
    %51 = vector.shape_cast %50 : vector<8x128xf32> to vector<1x8x128xf32>
    %cst_34 = arith.constant dense<0.000000e+00> : vector<8x128xf32>
    %52 = vector.multi_reduction <add>, %51, %cst_34 [0] : vector<1x8x128xf32> to vector<8x128xf32>
    %53 = vector.shape_cast %52 : vector<8x128xf32> to vector<1x8x128xf32>
    %54 = arith.addf %49, %53 : vector<1x8x128xf32>
    %c0_35 = arith.constant 0 : index
    %c0_36 = arith.constant 0 : index
    %c0_37 = arith.constant 0 : index
    %55 = vector.load %arg8[%c0_35, %c0_36, %c0_37] : memref<1x8x128xf32, #tpu.memory_space<vmem>>, vector<1x8x128xf32>
    tpu.vector_store %arg8[%c0_35, %c0_36, %c0_37], %54 {strides = array<i32>} : memref<1x8x128xf32, #tpu.memory_space<vmem>>, vector<1x8x128xf32>,
    return
  }
  func.func @transform_0(%arg0: i32, %arg1: i32) -> (i32, i32, i32) {
    %c0_i32 = arith.constant 0 : i32
    %c0_i32_0 = arith.constant 0 : i32
    return %arg1, %arg0, %c0_i32 : i32, i32, i32
  }
  func.func @transform_1(%arg0: i32, %arg1: i32) -> (i32, i32, i32) {
    %c0_i32 = arith.constant 0 : i32
    %c0_i32_0 = arith.constant 0 : i32
    return %arg1, %arg0, %c0_i32 : i32, i32, i32
  }
  func.func @transform_2(%arg0: i32, %arg1: i32) -> (i32, i32) {
    %c0_i32 = arith.constant 0 : i32
    %c0_i32_0 = arith.constant 0 : i32
    return %arg0, %c0_i32 : i32, i32
  }
  func.func @transform_3(%arg0: i32, %arg1: i32) -> (i32, i32, i32) {
    %c0_i32 = arith.constant 0 : i32
    %c0_i32_0 = arith.constant 0 : i32
    return %arg1, %arg0, %c0_i32 : i32, i32, i32
  }
  func.func @transform_4(%arg0: i32, %arg1: i32) -> (i32, i32, i32) {
    %c0_i32 = arith.constant 0 : i32
    %c0_i32_0 = arith.constant 0 : i32
    %c0_i32_1 = arith.constant 0 : i32
    return %arg0, %c0_i32, %c0_i32_0 : i32, i32, i32
  }
  func.func @transform_5(%arg0: i32, %arg1: i32) -> (i32, i32, i32) {
    %c0_i32 = arith.constant 0 : i32
    %c0_i32_0 = arith.constant 0 : i32
    %c0_i32_1 = arith.constant 0 : i32
    return %arg0, %c0_i32, %c0_i32_0 : i32, i32, i32
  }
  func.func @transform_6(%arg0: i32, %arg1: i32) -> (i32, i32, i32) {
    %c0_i32 = arith.constant 0 : i32
    %c0_i32_0 = arith.constant 0 : i32
    %c0_i32_1 = arith.constant 0 : i32
    return %arg0, %c0_i32, %c0_i32_0 : i32, i32, i32
  }
}

</mosaic_0001>

<bundles_post_ra>
// kernel: balance_cross_entropy_loss.2
= control target key start
LH: loop header
LB: loop body
LE: loop exit
PB: predicated region body
PF: predicated region fallthrough
CT: control target
= control target key end

     0   :  { %s281_s6 = smov 0   ;;  %s283_s7 = smov 0   ;;  %s313_s0 = inlined_call_operand.vmem [shape: f32[2,8,128], index: 0, kind: input, shape index: {}]   ;;  %s314_s1 = inlined_call_operand.vmem [shape: f32[8,128], index: 1, kind: output, shape index: {}]  }
   0x1   :  { %s285_s8 = smov 0  }
   0x2 LB: > { %s20_s9 = sadd.s32 1, %s263_s7  ;;  %p212_p0 = scmp.ge.s32.totalorder %s267_s8, 1  ;;  %s267_s8 = sphi %s285_s8, %s11_s8   ;;  %s263_s7 = sphi %s283_s7, %s316_s7   ;;  %s259_s6 = sphi %s281_s6, %s315_s6  }
   0x3   : > { %p21_p1 = scmp.ge.s32.totalorder %s20_s9, 2  ;;  %p103_p2 = scmp.lt.s32.totalorder %s267_s8, 3 }
   0x5   : > { %s318_s9 = smov (%p21_p1, %s20_s9), 0  ;;  %p104_p3 = pnand %p212_p0, %p103_p2 }
   0x6   : > { %p124_p4 = scmp.lt.s32.totalorder (!%p104_p3), %s259_s6, 1  ;;  %p214_p5 = scmp.ne.s32.totalorder (!%p104_p3), %s259_s6, 0 }
   0x7   : > { %107 = sbr.rel (%p104_p3) target bundleno = 28 (0x1c), region = 24 }
   0xe   : > { %s125_s10 = scalar_select %p124_p4, %s259_s6, 1 }
   0xf   : > { %138 = sbr.rel (%p214_p5) target bundleno = 22 (0x16), region = 28  ;;  %v269_v0 = vmov (!%p214_p5), 0.0  }
  0x10   : > { %s213_s11 = sshll.u32 %s125_s10, 3  ;;  %139 = vst [vmem:[%s314_s1] sm:$0xff] (!%p214_p5), %v269_v0 }
  0x11   : > { %s130_s14 = scalar_lea.vmem %s313_s0, %s213_s11 }
  0x16 PF: > { %v140_v1 = vld [vmem:[%s130_s14] sm:$0xff]  ;;  %v270_v3 = vmov 0.0  }
  0x17   : > { %v141_v2 = vld [vmem:[%s314_s1] sm:$0xff]  ;;  %vm142_vm0 = vcmp.ge.f32.partialorder %v140_v1, 1.0 }
  0x18   : > { %v215_v4 = vsel %vm142_vm0, 1.0, %v270_v3 }
  0x19   : > { %v145_v5 = vadd.f32 %v215_v4, %v141_v2 }
  0x1b   : > { %146 = vst [vmem:[%s314_s1] sm:$0xff] %v145_v5 }
  0x1c PF: > { %s11_s8 = sadd.s32 1, %s267_s8   ;;  %s315_s6 = smov %s263_s7 }
  0x1d   : > { %p8_p6 = scmp.ge.s32.totalorder %s11_s8, 4   ;;  %s316_s7 = smov %s318_s9 }
  0x1f   :  { %10 = sbr.rel (!%p8_p6) target bundleno = 2 (0x2), region = 58 }

// kernel: balance_cross_entropy_loss.3
= control target key start
LH: loop header
LB: loop body
LE: loop exit
PB: predicated region body
PF: predicated region fallthrough
CT: control target
= control target key end

     0   :  { %s697_s21 = smov 0   ;;  %s699_s22 = smov 0   ;;  %s773_s0 = inlined_call_operand.vmem [shape: f32[2,8,128], index: 0, kind: input, shape index: {}]   ;;  %s774_s1 = inlined_call_operand.vmem [shape: f32[2,8,128], index: 1, kind: input, shape index: {}]   ;;  %s775_s2 = inlined_call_operand.vmem [shape: f32[8,128], index: 2, kind: input, shape index: {}]   ;;  %s776_s3 = inlined_call_operand.vmem [shape: f32[2,8,128], index: 3, kind: output, shape index: {0}]   ;;  %s777_s4 = inlined_call_operand.vmem [shape: f32[1,8,128], index: 4, kind: output, shape index: {1}]   ;;  %s778_s5 = inlined_call_operand.vmem [shape: f32[1,8,128], index: 5, kind: output, shape index: {2}]   ;;  %s779_s6 = inlined_call_operand.vmem [shape: f32[1,8,128], index: 6, kind: output, shape index: {3}]  }
   0x1   :  { %s701_s23 = smov 0  }
   0x2 LB: > { %s26_s24 = sadd.s32 1, %s654_s22  ;;  %p594_p0 = scmp.ge.s32.totalorder %s658_s23, 1  ;;  %s658_s23 = sphi %s701_s23, %s17_s23   ;;  %s654_s22 = sphi %s699_s22, %s781_s22   ;;  %s650_s21 = sphi %s697_s21, %s780_s21  }
   0x3   : > { %p27_p1 = scmp.ge.s32.totalorder %s26_s24, 2  ;;  %p260_p2 = scmp.lt.s32.totalorder %s658_s23, 3 }
   0x5   : > { %s783_s24 = smov (%p27_p1, %s26_s24), 0  ;;  %p261_p3 = pnand %p594_p0, %p260_p2 }
   0x6   : > { %p317_p4 = scmp.lt.s32.totalorder (!%p261_p3), %s650_s21, 1  ;;  %p598_p5 = scmp.ne.s32.totalorder (!%p261_p3), %s650_s21, 0 }
   0x7   : > { %264 = sbr.rel (%p261_p3) target bundleno = 53 (0x35), region = 32 }
   0xe   : > { %s318_s25 = scalar_select %p317_p4, %s650_s21, 1 }
   0xf   : > { %357 = sbr.rel (%p598_p5) target bundleno = 22 (0x16), region = 36  ;;  %v660_v0 = vmov (!%p598_p5), 0.0  }
  0x10   : > { %s715_s26 = sshll.u32 %s318_s25, 3  ;;  %358 = vst [vmem:[%s777_s4] sm:$0xff] (!%p598_p5), %v660_v0  ;;  %359 = vst [vmem:[%s778_s5] sm:$0xff] (!%p598_p5), %v660_v0 }
  0x11   : > { %s323_s29 = scalar_lea.vmem %s773_s0, %s715_s26  ;;  %s330_s8 = scalar_lea.vmem %s774_s1, %s715_s26  ;;  %360 = vst [vmem:[%s779_s6] sm:$0xff] (!%p598_p5), %v660_v0 }
  0x12   : > { %s341_s11 = scalar_lea.vmem %s776_s3, %s715_s26 }
  0x16 PF: > { %v361_v1 = vld [vmem:[%s323_s29] sm:$0xff]  ;;  %v661_v5 = vmov 0.0  }
  0x17   : > { %v362_v2 = vld [vmem:[%s330_s8] sm:$0xff]  ;;  %632 = vlog2.f32 %v361_v1  ;;  %v367_v4 = vsub.f32 1.0, %v361_v1 }
  0x18   : > { %v363_v3 = vld [vmem:[%s775_s2] sm:$0xff]  ;;  %vm376_vm0 = vcmp.ge.f32.partialorder %v362_v2, 1.0  ;;  %vm379_vm1 = vcmp.le.f32.partialorder %v362_v2, 0.0  ;;  %v372_v19 = vsub.f32 1.0, %v362_v2 }
  0x19   : > { %v599_v6 = vsel %vm376_vm0, 1.0, %v661_v5  ;;  %v390_v7 = vld [vmem:[%s778_s5] sm:$0xff]  ;;  %634 = vlog2.f32 %v367_v4  ;;  %v600_v8 = vsel %vm379_vm1, 1.0, %v661_v5 }
  0x1a   : > { %v391_v9 = vmul.f32 %v599_v6, %v363_v3  ;;  %v395_v10 = vld [vmem:[%s779_s6] sm:$0xff]  ;;  %v396_v11 = vmul.f32 %v600_v8, %v363_v3 }
  0x1b   : > { %v384_v27 = vld [vmem:[%s777_s4] sm:$0xff] }
  0x1c   : > { %v393_v12 = vadd.f32 %v391_v9, %v390_v7  ;;  %v398_v13 = vadd.f32 %v396_v11, %v395_v10 }
  0x1e   : > { %394 = vst [vmem:[%s778_s5] sm:$0xff] %v393_v12  ;;  %399 = vst [vmem:[%s779_s6] sm:$0xff] %v398_v13 }
  0x21   : > { %v633_v14 = vpop.eup %632 }
  0x22   : > { %v365_v15 = vmul.f32 0.6931472, %v633_v14 }
  0x23   : > { %v635_v16 = vpop.eup %634 }
  0x24   : > { %v366_v17 = vmax.f32 %v365_v15, -100.0  ;;  %v369_v18 = vmul.f32 0.6931472, %v635_v16 }
  0x26   : > { %v370_v20 = vmax.f32 %v369_v18, -100.0  ;;  %v371_v21 = vmul.f32 %v366_v17, %v362_v2 }
  0x28   : > { %v373_v22 = vmul.f32 %v372_v19, %v370_v20 }
  0x2a   : > { %v374_v23 = vadd.f32 %v373_v22, %v371_v21 }
  0x2c   : > { %v375_v24 = vsub.f32 0.0, %v374_v23 }
  0x2e   : > { %v382_v25 = vmul.f32 %v600_v8, %v375_v24  ;;  %v385_v26 = vmul.f32 %v599_v6, %v375_v24 }
  0x30   : > { %383 = vst [vmem:[%s341_s11] sm:$0xff] %v382_v25  ;;  %v386_v28 = vmul.f32 %v385_v26, %v363_v3 }
  0x32   : > { %v388_v29 = vadd.f32 %v386_v28, %v384_v27 }
  0x34   : > { %389 = vst [vmem:[%s777_s4] sm:$0xff] %v388_v29 }
  0x35 PF: > { %s17_s23 = sadd.s32 1, %s658_s23   ;;  %s780_s21 = smov %s654_s22 }
  0x36   : > { %p14_p6 = scmp.ge.s32.totalorder %s17_s23, 4   ;;  %s781_s22 = smov %s783_s24 }
  0x38   :  { %16 = sbr.rel (!%p14_p6) target bundleno = 2 (0x2), region = 108 }

</bundles_post_ra>
